<compile_context>
chip_gen: v5e
topology: v5e:2x2
jax: 0.10.0
libtpu: 0.0.40
codegen_flags: <defaults>
</compile_context>

<pallas_src>
import numpy as np
import jax
import jax.numpy as jnp
from jax.experimental import pallas as pl
from jax.experimental.pallas import tpu as pltpu

EPS = 1e-5


def _make_kernel(N, H, W, C):
    count = float(N * H * W)  # BN normalizer (per-channel element count)

    def kernel(x_ref, w1_ref, w2_ref, p_ref, s_ref,
               g1_ref, be1_ref, g2_ref, be2_ref, o_ref):
        x = x_ref[...]                     # (N*H, W*C), lane-dense
        p_up = p_ref[0]                    # (R,R): row r <- row r-1 (0 at image top)
        p_dn = p_ref[1]                    # (R,R): row r <- row r+1 (0 at image bottom)
        smat = s_ref[...]                  # (L,L): per-channel sum + broadcast over W

        def conv3x3(a, wm_ref):
            # dy taps via masked row-shift matmuls; dx taps + W-padding are
            # folded into the block-tridiagonal weight slabs wm_ref[dy].
            a_up = jnp.dot(p_up, a, preferred_element_type=jnp.float32)
            a_dn = jnp.dot(p_dn, a, preferred_element_type=jnp.float32)
            acc = jnp.dot(a_up, wm_ref[0], preferred_element_type=jnp.float32)
            acc = acc + jnp.dot(a, wm_ref[1], preferred_element_type=jnp.float32)
            acc = acc + jnp.dot(a_dn, wm_ref[2], preferred_element_type=jnp.float32)
            return acc

        def batchnorm(y, gamma, beta):
            # training-mode BN: biased batch stats over (N,H,W) per channel.
            # One sublane reduction + one tiny matmul per statistic; (y-mean)
            # is reused for variance and normalization (no E[x^2]-E[x]^2).
            mean = jnp.dot(jnp.sum(y, axis=0, keepdims=True), smat,
                           preferred_element_type=jnp.float32) * (1.0 / count)
            d = y - mean
            var = jnp.dot(jnp.sum(d * d, axis=0, keepdims=True), smat,
                          preferred_element_type=jnp.float32) * (1.0 / count)
            return d * jax.lax.rsqrt(var + EPS) * gamma + beta

        y1 = conv3x3(x, w1_ref)                                   # no bias: cancels in BN
        y1 = jnp.maximum(batchnorm(y1, g1_ref[...], be1_ref[...]), 0.0)
        y2 = conv3x3(y1, w2_ref)                                  # no bias: cancels in BN
        y2 = batchnorm(y2, g2_ref[...], be2_ref[...])
        o_ref[...] = jnp.maximum(y2 + x, 0.0).astype(o_ref.dtype)  # identity shortcut = x

    return kernel


def resblock_pallas(x_nchw, params):
    """x_nchw: (N, C, H, W) float32.
    params = (w1, b1, g1, be1, w2, b2, g2, be2); conv weights are HWIO
    (3,3,Cin,Cout). Conv biases are accepted but unused — they cancel exactly
    under training-mode BatchNorm."""
    w1, _b1, g1, be1, w2, _b2, g2, be2 = params
    N, C, H, W = x_nchw.shape
    R, L = N * H, W * C
    f32 = jnp.float32

    # lane-dense activation layout: (N, C, H, W) -> (N*H, W*C)
    xf = jnp.transpose(x_nchw, (0, 2, 3, 1)).reshape(R, L).astype(f32)

    # block-tridiagonal conv matrices: one (W*C, W*C) slab per dy tap.
    # block (w_in, w_out) = W[dy, (w_in - w_out) + 1] if |w_in - w_out| <= 1.
    def build_wmat(w_hwio):
        mats = []
        for dy in range(3):
            m = sum(jnp.kron(jnp.eye(W, k=-sx, dtype=f32),
                             w_hwio[dy, sx + 1].astype(f32))
                    for sx in (-1, 0, 1))
            mats.append(m)
        return jnp.stack(mats)                                   # (3, L, L)

    # masked row-shift matrices for the dy = -1 / +1 taps (zero across image
    # boundaries -> same effect as 1-pixel zero padding in H).
    def build_shift(sy):
        h = jnp.arange(R) % H
        valid = ((h + sy) >= 0) & ((h + sy) < H)
        return jnp.eye(R, k=sy, dtype=f32) * valid.astype(f32)[:, None]

    pmat = jnp.stack([build_shift(-1), build_shift(1)])          # (2, R, R)
    # channel-sum-and-broadcast matrix for BN stats in the lane-dense layout
    smat = jnp.kron(jnp.ones((W, W), f32), jnp.eye(C, dtype=f32))  # (L, L)

    def tile_lane(v):                                            # (C,) -> (1, W*C)
        return jnp.tile(v.astype(f32), W).reshape(1, L)

    vmem = pl.BlockSpec(memory_space=pltpu.MemorySpace.VMEM)
    out = pl.pallas_call(
        _make_kernel(N, H, W, C),
        out_shape=jax.ShapeDtypeStruct((R, L), x_nchw.dtype),
        in_specs=[vmem] * 9,
        out_specs=vmem,
    )(xf, build_wmat(w1), build_wmat(w2), pmat, smat,
      tile_lane(g1), tile_lane(be1), tile_lane(g2), tile_lane(be2))

    return jnp.transpose(out.reshape(N, H, W, C), (0, 3, 1, 2))


def resblock_reference(x_nchw, params):
    """Pure-JAX reference matching the PyTorch forward (training-mode BN)."""
    w1, b1, g1, be1, w2, b2, g2, be2 = params

    def conv(x, w_hwio, b):
        w_oihw = jnp.transpose(w_hwio, (3, 2, 0, 1))
        y = jax.lax.conv_general_dilated(
            x, w_oihw, window_strides=(1, 1), padding=((1, 1), (1, 1)),
            dimension_numbers=('NCHW', 'OIHW', 'NCHW'))
        return y + b[None, :, None, None]

    def bn(y, g, be):
        mean = y.mean(axis=(0, 2, 3), keepdims=True)
        var = ((y - mean) ** 2).mean(axis=(0, 2, 3), keepdims=True)
        return (y - mean) / jnp.sqrt(var + EPS) * g[None, :, None, None] \
            + be[None, :, None, None]

    s = x_nchw
    y = jax.nn.relu(bn(conv(x_nchw, w1, b1), g1, be1))
    y = bn(conv(y, w2, b2), g2, be2)
    return jax.nn.relu(y + s)


if __name__ == "__main__":
    # in_channels == out_channels (identity shortcut); W * C = 128 -> lane-dense
    N, C, H, W = 2, 8, 16, 16
    key = jax.random.PRNGKey(0)
    ks = jax.random.split(key, 9)

    x = jax.random.normal(ks[0], (N, C, H, W), jnp.float32)

    w1 = 0.1 * jax.random.normal(ks[1], (3, 3, C, C), jnp.float32)   # HWIO
    b1 = 0.05 * jax.random.normal(ks[2], (C,), jnp.float32)
    w2 = 0.1 * jax.random.normal(ks[3], (3, 3, C, C), jnp.float32)   # HWIO
    b2 = 0.05 * jax.random.normal(ks[4], (C,), jnp.float32)
    g1 = 1.0 + 0.1 * jax.random.normal(ks[5], (C,), jnp.float32)
    be1 = 0.1 * jax.random.normal(ks[6], (C,), jnp.float32)
    g2 = 1.0 + 0.1 * jax.random.normal(ks[7], (C,), jnp.float32)
    be2 = 0.1 * jax.random.normal(ks[8], (C,), jnp.float32)

    params = (w1, b1, g1, be1, w2, b2, g2, be2)

    out = jax.block_until_ready(resblock_pallas(x, params))
    ref = jax.block_until_ready(resblock_reference(x, params))

    np.testing.assert_allclose(np.asarray(out), np.asarray(ref),
                               rtol=1e-4, atol=1e-4)
    print("KERNEL_OK")
</pallas_src>

<mosaic_0001>
module attributes {stable_mosaic.version = 11 : i64} {
  func.func @kernel(%arg0: memref<32x128xf32, #tpu.memory_space<vmem>>, %arg1: memref<3x128x128xf32, #tpu.memory_space<vmem>>, %arg2: memref<3x128x128xf32, #tpu.memory_space<vmem>>, %arg3: memref<2x32x32xf32, #tpu.memory_space<vmem>>, %arg4: memref<128x128xf32, #tpu.memory_space<vmem>>, %arg5: memref<1x128xf32, #tpu.memory_space<vmem>>, %arg6: memref<1x128xf32, #tpu.memory_space<vmem>>, %arg7: memref<1x128xf32, #tpu.memory_space<vmem>>, %arg8: memref<1x128xf32, #tpu.memory_space<vmem>>, %arg9: memref<32x128xf32, #tpu.memory_space<vmem>>) attributes {dimension_semantics = [], scalar_prefetch = 0 : i64, scratch_operands = 0 : i64, tpu.core_type = #tpu.core_type<tc>} {
    %c0 = arith.constant 0 : index
    %c0_0 = arith.constant 0 : index
    %0 = vector.load %arg0[%c0, %c0_0] : memref<32x128xf32, #tpu.memory_space<vmem>>, vector<32x128xf32>
    %c0_1 = arith.constant 0 : index
    %c0_2 = arith.constant 0 : index
    %c0_3 = arith.constant 0 : index
    %1 = vector.load %arg3[%c0_1, %c0_2, %c0_3] : memref<2x32x32xf32, #tpu.memory_space<vmem>>, vector<1x32x32xf32>
    %2 = vector.shape_cast %1 : vector<1x32x32xf32> to vector<32x32xf32>
    %c1 = arith.constant 1 : index
    %c0_4 = arith.constant 0 : index
    %c0_5 = arith.constant 0 : index
    %3 = vector.load %arg3[%c1, %c0_4, %c0_5] : memref<2x32x32xf32, #tpu.memory_space<vmem>>, vector<1x32x32xf32>
    %4 = vector.shape_cast %3 : vector<1x32x32xf32> to vector<32x32xf32>
    %c0_6 = arith.constant 0 : index
    %c0_7 = arith.constant 0 : index
    %5 = vector.load %arg4[%c0_6, %c0_7] : memref<128x128xf32, #tpu.memory_space<vmem>>, vector<128x128xf32>
    %cst = arith.constant dense<0.000000e+00> : vector<32x128xf32>
    %6 = tpu.matmul %2, %0, %cst {dimension_numbers = #tpu.dot_dimension_numbers<[1], [0], [0], [1], [0, 0, 1, 1], [], []>} : vector<32x32xf32>, vector<32x128xf32>, vector<32x128xf32> -> vector<32x128xf32>
    %cst_8 = arith.constant dense<0.000000e+00> : vector<32x128xf32>
    %7 = tpu.matmul %4, %0, %cst_8 {dimension_numbers = #tpu.dot_dimension_numbers<[1], [0], [0], [1], [0, 0, 1, 1], [], []>} : vector<32x32xf32>, vector<32x128xf32>, vector<32x128xf32> -> vector<32x128xf32>
    %c0_9 = arith.constant 0 : index
    %c0_10 = arith.constant 0 : index
    %c0_11 = arith.constant 0 : index
    %8 = vector.load %arg1[%c0_9, %c0_10, %c0_11] : memref<3x128x128xf32, #tpu.memory_space<vmem>>, vector<1x128x128xf32>
    %9 = vector.shape_cast %8 : vector<1x128x128xf32> to vector<128x128xf32>
    %cst_12 = arith.constant dense<0.000000e+00> : vector<32x128xf32>
    %10 = tpu.matmul %6, %9, %cst_12 {dimension_numbers = #tpu.dot_dimension_numbers<[1], [0], [0], [1], [0, 0, 1, 1], [], []>} : vector<32x128xf32>, vector<128x128xf32>, vector<32x128xf32> -> vector<32x128xf32>
    %c1_13 = arith.constant 1 : index
    %c0_14 = arith.constant 0 : index
    %c0_15 = arith.constant 0 : index
    %11 = vector.load %arg1[%c1_13, %c0_14, %c0_15] : memref<3x128x128xf32, #tpu.memory_space<vmem>>, vector<1x128x128xf32>
    %12 = vector.shape_cast %11 : vector<1x128x128xf32> to vector<128x128xf32>
    %cst_16 = arith.constant dense<0.000000e+00> : vector<32x128xf32>
    %13 = tpu.matmul %0, %12, %cst_16 {dimension_numbers = #tpu.dot_dimension_numbers<[1], [0], [0], [1], [0, 0, 1, 1], [], []>} : vector<32x128xf32>, vector<128x128xf32>, vector<32x128xf32> -> vector<32x128xf32>
    %14 = arith.addf %10, %13 : vector<32x128xf32>
    %c2 = arith.constant 2 : index
    %c0_17 = arith.constant 0 : index
    %c0_18 = arith.constant 0 : index
    %15 = vector.load %arg1[%c2, %c0_17, %c0_18] : memref<3x128x128xf32, #tpu.memory_space<vmem>>, vector<1x128x128xf32>
    %16 = vector.shape_cast %15 : vector<1x128x128xf32> to vector<128x128xf32>
    %cst_19 = arith.constant dense<0.000000e+00> : vector<32x128xf32>
    %17 = tpu.matmul %7, %16, %cst_19 {dimension_numbers = #tpu.dot_dimension_numbers<[1], [0], [0], [1], [0, 0, 1, 1], [], []>} : vector<32x128xf32>, vector<128x128xf32>, vector<32x128xf32> -> vector<32x128xf32>
    %18 = arith.addf %14, %17 : vector<32x128xf32>
    %c0_20 = arith.constant 0 : index
    %c0_21 = arith.constant 0 : index
    %19 = vector.load %arg5[%c0_20, %c0_21] : memref<1x128xf32, #tpu.memory_space<vmem>>, vector<1x128xf32>
    %c0_22 = arith.constant 0 : index
    %c0_23 = arith.constant 0 : index
    %20 = vector.load %arg6[%c0_22, %c0_23] : memref<1x128xf32, #tpu.memory_space<vmem>>, vector<1x128xf32>
    %cst_24 = arith.constant dense<0.000000e+00> : vector<128xf32>
    %21 = vector.multi_reduction <add>, %18, %cst_24 [0] : vector<32x128xf32> to vector<128xf32>
    %22 = vector.shape_cast %21 : vector<128xf32> to vector<1x128xf32>
    %cst_25 = arith.constant dense<0.000000e+00> : vector<1x128xf32>
    %23 = tpu.matmul %22, %5, %cst_25 {dimension_numbers = #tpu.dot_dimension_numbers<[1], [0], [0], [1], [0, 0, 1, 1], [], []>} : vector<1x128xf32>, vector<128x128xf32>, vector<1x128xf32> -> vector<1x128xf32>
    %cst_26 = arith.constant 0.001953125 : f32
    %24 = vector.broadcast %cst_26 : f32 to vector<1x128xf32>
    %25 = arith.mulf %23, %24 : vector<1x128xf32>
    %26 = vector.broadcast %25 : vector<1x128xf32> to vector<32x128xf32>
    %27 = arith.subf %18, %26 : vector<32x128xf32>
    %28 = arith.mulf %27, %27 : vector<32x128xf32>
    %cst_27 = arith.constant dense<0.000000e+00> : vector<128xf32>
    %29 = vector.multi_reduction <add>, %28, %cst_27 [0] : vector<32x128xf32> to vector<128xf32>
    %30 = vector.shape_cast %29 : vector<128xf32> to vector<1x128xf32>
    %cst_28 = arith.constant dense<0.000000e+00> : vector<1x128xf32>
    %31 = tpu.matmul %30, %5, %cst_28 {dimension_numbers = #tpu.dot_dimension_numbers<[1], [0], [0], [1], [0, 0, 1, 1], [], []>} : vector<1x128xf32>, vector<128x128xf32>, vector<1x128xf32> -> vector<1x128xf32>
    %cst_29 = arith.constant 0.001953125 : f32
    %32 = vector.broadcast %cst_29 : f32 to vector<1x128xf32>
    %33 = arith.mulf %31, %32 : vector<1x128xf32>
    %cst_30 = arith.constant 9.99999974E-6 : f32
    %34 = vector.broadcast %cst_30 : f32 to vector<1x128xf32>
    %35 = arith.addf %33, %34 : vector<1x128xf32>
    %36 = math.rsqrt %35 : vector<1x128xf32>
    %37 = vector.broadcast %36 : vector<1x128xf32> to vector<32x128xf32>
    %38 = arith.mulf %27, %37 : vector<32x128xf32>
    %39 = vector.broadcast %19 : vector<1x128xf32> to vector<32x128xf32>
    %40 = arith.mulf %38, %39 : vector<32x128xf32>
    %41 = vector.broadcast %20 : vector<1x128xf32> to vector<32x128xf32>
    %42 = arith.addf %40, %41 : vector<32x128xf32>
    %cst_31 = arith.constant 0.000000e+00 : f32
    %43 = vector.broadcast %cst_31 : f32 to vector<32x128xf32>
    %44 = arith.maximumf %42, %43 : vector<32x128xf32>
    %cst_32 = arith.constant dense<0.000000e+00> : vector<32x128xf32>
    %45 = tpu.matmul %2, %44, %cst_32 {dimension_numbers = #tpu.dot_dimension_numbers<[1], [0], [0], [1], [0, 0, 1, 1], [], []>} : vector<32x32xf32>, vector<32x128xf32>, vector<32x128xf32> -> vector<32x128xf32>
    %cst_33 = arith.constant dense<0.000000e+00> : vector<32x128xf32>
    %46 = tpu.matmul %4, %44, %cst_33 {dimension_numbers = #tpu.dot_dimension_numbers<[1], [0], [0], [1], [0, 0, 1, 1], [], []>} : vector<32x32xf32>, vector<32x128xf32>, vector<32x128xf32> -> vector<32x128xf32>
    %c0_34 = arith.constant 0 : index
    %c0_35 = arith.constant 0 : index
    %c0_36 = arith.constant 0 : index
    %47 = vector.load %arg2[%c0_34, %c0_35, %c0_36] : memref<3x128x128xf32, #tpu.memory_space<vmem>>, vector<1x128x128xf32>
    %48 = vector.shape_cast %47 : vector<1x128x128xf32> to vector<128x128xf32>
    %cst_37 = arith.constant dense<0.000000e+00> : vector<32x128xf32>
    %49 = tpu.matmul %45, %48, %cst_37 {dimension_numbers = #tpu.dot_dimension_numbers<[1], [0], [0], [1], [0, 0, 1, 1], [], []>} : vector<32x128xf32>, vector<128x128xf32>, vector<32x128xf32> -> vector<32x128xf32>
    %c1_38 = arith.constant 1 : index
    %c0_39 = arith.constant 0 : index
    %c0_40 = arith.constant 0 : index
    %50 = vector.load %arg2[%c1_38, %c0_39, %c0_40] : memref<3x128x128xf32, #tpu.memory_space<vmem>>, vector<1x128x128xf32>
    %51 = vector.shape_cast %50 : vector<1x128x128xf32> to vector<128x128xf32>
    %cst_41 = arith.constant dense<0.000000e+00> : vector<32x128xf32>
    %52 = tpu.matmul %44, %51, %cst_41 {dimension_numbers = #tpu.dot_dimension_numbers<[1], [0], [0], [1], [0, 0, 1, 1], [], []>} : vector<32x128xf32>, vector<128x128xf32>, vector<32x128xf32> -> vector<32x128xf32>
    %53 = arith.addf %49, %52 : vector<32x128xf32>
    %c2_42 = arith.constant 2 : index
    %c0_43 = arith.constant 0 : index
    %c0_44 = arith.constant 0 : index
    %54 = vector.load %arg2[%c2_42, %c0_43, %c0_44] : memref<3x128x128xf32, #tpu.memory_space<vmem>>, vector<1x128x128xf32>
    %55 = vector.shape_cast %54 : vector<1x128x128xf32> to vector<128x128xf32>
    %cst_45 = arith.constant dense<0.000000e+00> : vector<32x128xf32>
    %56 = tpu.matmul %46, %55, %cst_45 {dimension_numbers = #tpu.dot_dimension_numbers<[1], [0], [0], [1], [0, 0, 1, 1], [], []>} : vector<32x128xf32>, vector<128x128xf32>, vector<32x128xf32> -> vector<32x128xf32>
    %57 = arith.addf %53, %56 : vector<32x128xf32>
    %c0_46 = arith.constant 0 : index
    %c0_47 = arith.constant 0 : index
    %58 = vector.load %arg7[%c0_46, %c0_47] : memref<1x128xf32, #tpu.memory_space<vmem>>, vector<1x128xf32>
    %c0_48 = arith.constant 0 : index
    %c0_49 = arith.constant 0 : index
    %59 = vector.load %arg8[%c0_48, %c0_49] : memref<1x128xf32, #tpu.memory_space<vmem>>, vector<1x128xf32>
    %cst_50 = arith.constant dense<0.000000e+00> : vector<128xf32>
    %60 = vector.multi_reduction <add>, %57, %cst_50 [0] : vector<32x128xf32> to vector<128xf32>
    %61 = vector.shape_cast %60 : vector<128xf32> to vector<1x128xf32>
    %cst_51 = arith.constant dense<0.000000e+00> : vector<1x128xf32>
    %62 = tpu.matmul %61, %5, %cst_51 {dimension_numbers = #tpu.dot_dimension_numbers<[1], [0], [0], [1], [0, 0, 1, 1], [], []>} : vector<1x128xf32>, vector<128x128xf32>, vector<1x128xf32> -> vector<1x128xf32>
    %cst_52 = arith.constant 0.001953125 : f32
    %63 = vector.broadcast %cst_52 : f32 to vector<1x128xf32>
    %64 = arith.mulf %62, %63 : vector<1x128xf32>
    %65 = vector.broadcast %64 : vector<1x128xf32> to vector<32x128xf32>
    %66 = arith.subf %57, %65 : vector<32x128xf32>
    %67 = arith.mulf %66, %66 : vector<32x128xf32>
    %cst_53 = arith.constant dense<0.000000e+00> : vector<128xf32>
    %68 = vector.multi_reduction <add>, %67, %cst_53 [0] : vector<32x128xf32> to vector<128xf32>
    %69 = vector.shape_cast %68 : vector<128xf32> to vector<1x128xf32>
    %cst_54 = arith.constant dense<0.000000e+00> : vector<1x128xf32>
    %70 = tpu.matmul %69, %5, %cst_54 {dimension_numbers = #tpu.dot_dimension_numbers<[1], [0], [0], [1], [0, 0, 1, 1], [], []>} : vector<1x128xf32>, vector<128x128xf32>, vector<1x128xf32> -> vector<1x128xf32>
    %cst_55 = arith.constant 0.001953125 : f32
    %71 = vector.broadcast %cst_55 : f32 to vector<1x128xf32>
    %72 = arith.mulf %70, %71 : vector<1x128xf32>
    %cst_56 = arith.constant 9.99999974E-6 : f32
    %73 = vector.broadcast %cst_56 : f32 to vector<1x128xf32>
    %74 = arith.addf %72, %73 : vector<1x128xf32>
    %75 = math.rsqrt %74 : vector<1x128xf32>
    %76 = vector.broadcast %75 : vector<1x128xf32> to vector<32x128xf32>
    %77 = arith.mulf %66, %76 : vector<32x128xf32>
    %78 = vector.broadcast %58 : vector<1x128xf32> to vector<32x128xf32>
    %79 = arith.mulf %77, %78 : vector<32x128xf32>
    %80 = vector.broadcast %59 : vector<1x128xf32> to vector<32x128xf32>
    %81 = arith.addf %79, %80 : vector<32x128xf32>
    %82 = arith.addf %81, %0 : vector<32x128xf32>
    %cst_57 = arith.constant 0.000000e+00 : f32
    %83 = vector.broadcast %cst_57 : f32 to vector<32x128xf32>
    %84 = arith.maximumf %82, %83 : vector<32x128xf32>
    %c0_58 = arith.constant 0 : index
    %c0_59 = arith.constant 0 : index
    %85 = vector.load %arg9[%c0_58, %c0_59] : memref<32x128xf32, #tpu.memory_space<vmem>>, vector<32x128xf32>
    tpu.vector_store %arg9[%c0_58, %c0_59], %84 {strides = array<i32>} : memref<32x128xf32, #tpu.memory_space<vmem>>, vector<32x128xf32>,
    return
  }
}

</mosaic_0001>

<bundles_post_ra>
// kernel: tpu_custom_call.1
= control target key start
LH: loop header
LB: loop body
LE: loop exit
PB: predicated region body
PF: predicated region fallthrough
CT: control target
= control target key end

     0   :  { %14 = vsyncpa [#allocation3], 0  ;;  %s1285_s0 = inlined_call_operand.hbm [shape: f32[32,128], index: 0, kind: input, shape index: {}]   ;;  %s1286_s1 = inlined_call_operand.hbm [shape: f32[3,128,128], index: 1, kind: input, shape index: {}]   ;;  %s1287_s2 = inlined_call_operand.hbm [shape: f32[3,128,128], index: 2, kind: input, shape index: {}]   ;;  %s1288_s3 = inlined_call_operand.hbm [shape: f32[2,32,32], index: 3, kind: input, shape index: {}]   ;;  %s1289_s4 = inlined_call_operand.hbm [shape: f32[128,128], index: 4, kind: input, shape index: {}]   ;;  %s1290_s5 = inlined_call_operand.vmem [shape: f32[1,128], index: 5, kind: input, shape index: {}]   ;;  %s1291_s6 = inlined_call_operand.vmem [shape: f32[1,128], index: 6, kind: input, shape index: {}]   ;;  %s1292_s7 = inlined_call_operand.vmem [shape: f32[1,128], index: 7, kind: input, shape index: {}]   ;;  %s1293_s8 = inlined_call_operand.vmem [shape: f32[1,128], index: 8, kind: input, shape index: {}]   ;;  %s1294_s9 = inlined_call_operand.hbm [shape: f32[32,128], index: 9, kind: output, shape index: {}]  }
   0x1   :  { %15 = vsyncpa [#allocation6], 0 }
   0x2   :  { %16 = vsyncpa [#allocation9], 0 }
   0x3   :  { %17 = vsyncpa [#allocation4], 0  ;;  %s35_s11 = sshll.u32 %s1286_s1, 4  ;;  %s990_s12 = smov [#allocation5]   ;;  %s36_s11 = int_to_ptr.hbm [resolvable:$true] %s35_s11 }
   0x4   :  { %s37_s13 = sshll.u32 %s990_s12, 4  ;;  %s61_s16 = sshll.u32 %s1288_s3, 4  ;;  %s38_s13 = int_to_ptr.vmem [resolvable:$true] %s37_s13  ;;  %s62_s16 = int_to_ptr.hbm [resolvable:$true] %s61_s16 }
   0x5   :  { %s991_s17 = smov 128   ;;  %s992_s18 = smov 8  }
   0x6   :  { %43 = dma.hbm_to_vmem [thread:$0]  %s36_s11, 6144, %s38_s13, [#allocation6], %s991_s17, %s991_s17, %s992_s18  }
   0x7   :  { %s993_s19 = smov [#allocation8]   ;;  %s22_s1 = sshll.u32 %s1285_s0, 4  ;;  %s23_s1 = int_to_ptr.hbm [resolvable:$true] %s22_s1 }
   0x8   :  { %s63_s20 = sshll.u32 %s993_s19, 4  ;;  %s48_s24 = sshll.u32 %s1287_s2, 4  ;;  %s64_s20 = int_to_ptr.vmem [resolvable:$true] %s63_s20  ;;  %s49_s24 = int_to_ptr.hbm [resolvable:$true] %s48_s24 }
   0x9   :  { %69 = dma.hbm_to_vmem [thread:$0]  %s62_s16, 1024, %s64_s20, [#allocation9], %s991_s17, %s991_s17, %s992_s18  }
   0xa   :  { %s994_s25 = smov [#allocation2]   ;;  %s995_s27 = smov [#allocation7]  }
   0xb   :  { %s24_s26 = sshll.u32 %s994_s25, 4  ;;  %s50_s0 = sshll.u32 %s995_s27, 4  ;;  %s25_s26 = int_to_ptr.vmem [resolvable:$true] %s24_s26  ;;  %s51_s0 = int_to_ptr.vmem [resolvable:$true] %s50_s0 }
   0xc   :  { %30 = dma.hbm_to_vmem [thread:$0]  %s23_s1, 512, %s25_s26, [#allocation3], %s991_s17, %s991_s17, %s992_s18  }
   0xd   :  { %s74_s30 = sshll.u32 %s1289_s4, 4  ;;  %s996_s2 = smov [#allocation10]   ;;  %s75_s30 = int_to_ptr.hbm [resolvable:$true] %s74_s30 }
   0xe   :  { %56 = dma.hbm_to_vmem [thread:$0]  %s49_s24, 6144, %s51_s0, [#allocation6], %s991_s17, %s991_s17, %s992_s18  }
   0xf   :  { %s76_s10 = sshll.u32 %s996_s2, 4  ;;  %s77_s10 = int_to_ptr.vmem [resolvable:$true] %s76_s10 }
  0x10   :  { %82 = dma.hbm_to_vmem [thread:$0]  %s75_s30, 2048, %s77_s10, [#allocation9], %s991_s17, %s991_s17, %s992_s18  }
  0x11   :  { %982 = dma.done.wait [#allocation3], 512  }
  0x12   :  { %983 = vsyncadd [#allocation3], 4294966784 }
  0x13   :  { %984 = dma.done.wait [#allocation6], 12288  }
  0x14   :  { %985 = vsyncadd [#allocation6], 4294955008 }
  0x15   :  { %986 = dma.done.wait [#allocation9], 3072  }
  0x16   :  { %987 = vsyncadd [#allocation9], 4294964224  ;;  %v1078_v0 = vld [vmem:[#allocation2 + $0x18] sm:$0xff]  ;;  %v1080_v1 = vld [vmem:[#allocation2 + $0x10] sm:$0xff]  ;;  %vm140_vm0 = vcmask 261120   ;;  %s787_s20 = sshll.u32 %s1294_s9, 4  ;;  %s788_s20 = int_to_ptr.hbm [resolvable:$true] %s787_s20 }
  0x17   :  { %165 = vmatpush.msra.mxu2 %v1078_v0  ;;  %206 = vmatpush.msra.mxu1 %v1078_v0  ;;  %v1084_v2 = vld [vmem:[#allocation2 + $0x8] sm:$0xff]  ;;  %v1088_v3 = vld [vmem:[#allocation2] sm:$0xff]  ;;  %v238_v4 = vld [vmem:[#allocation5 + $0x78] sm:$0xff] }
  0x18   :  { %v1091_v5 = vld [vmem:[#allocation8] sm:$0xff]  ;;  %v255_v7 = vld [vmem:[#allocation5 + $0xf8] sm:$0xff]  ;;  %285 = vmatpush.msra.mxu3 %v238_v4  ;;  %v237_v8 = vld [vmem:[#allocation5 + $0x70] sm:$0xff] }
  0x19   :  { %166 = vmatpush.msra.mxu2 %v1080_v1  ;;  %207 = vmatpush.msra.mxu1 %v1080_v1  ;;  %v1094_v6 = vld [vmem:[#allocation8 + $0x20] sm:$0xff]  ;;  %v330_v9 = vld [vmem:[#allocation5 + $0x178] sm:$0xff]  ;;  %v254_v10 = vld [vmem:[#allocation5 + $0xf0] sm:$0xff] }
  0x1a   :  { %v236_v11 = vld [vmem:[#allocation5 + $0x68] sm:$0xff]  ;;  %286 = vmatpush.msra.mxu3 %v237_v8  ;;  %v329_v12 = vld [vmem:[#allocation5 + $0x170] sm:$0xff]  ;;  %v235_v14 = vld [vmem:[#allocation5 + $0x60] sm:$0xff]  ;;  %331 = vmatpush.msra.mxu0 %v330_v9 }
  0x1b   :  { %167 = vmatpush.msra.mxu2 %v1084_v2  ;;  %208 = vmatpush.msra.mxu1 %v1084_v2  ;;  %v253_v13 = vld [vmem:[#allocation5 + $0xe8] sm:$0xff]  ;;  %v252_v16 = vld [vmem:[#allocation5 + $0xe0] sm:$0xff]  ;;  %v234_v17 = vld [vmem:[#allocation5 + $0x58] sm:$0xff] }
  0x1c   :  { %287 = vmatpush.msra.mxu3 %v236_v11  ;;  %v328_v15 = vld [vmem:[#allocation5 + $0x168] sm:$0xff]  ;;  %332 = vmatpush.msra.mxu0 %v329_v12  ;;  %v251_v20 = vld [vmem:[#allocation5 + $0xd8] sm:$0xff]  ;;  %v233_v21 = vld [vmem:[#allocation5 + $0x50] sm:$0xff] }
  0x1d   :  { %168 = vmatpush.msra.mxu2 %v1088_v3  ;;  %209 = vmatpush.msra.mxu1 %v1088_v3  ;;  %v1102_v18 = vld [vmem:[#allocation8 + $0x8] sm:$0xff]  ;;  %v327_v22 = vld [vmem:[#allocation5 + $0x160] sm:$0xff]  ;;  %v250_v23 = vld [vmem:[#allocation5 + $0xd0] sm:$0xff] }
  0x1e   :  { %802 = vmatmul.msk.f32.vlgmr.msra.gmra.mxu2 %vm140_vm0, %v1091_v5  ;;  %806 = vmatmul.msk.f32.vlgmr.msra.gmra.mxu1 %vm140_vm0, %v1094_v6  ;;  %v1104_v19 = vld [vmem:[#allocation8 + $0x28] sm:$0xff]  ;;  %v231_v26 = vld [vmem:[#allocation5 + $0x40] sm:$0xff]  ;;  %v326_v27 = vld [vmem:[#allocation5 + $0x158] sm:$0xff] }
  0x1f   :  { %256 = vmatpush.msrb.mxu2 %v255_v7  ;;  %288 = vmatpush.msra.mxu3 %v235_v14  ;;  %v249_v24 = vld [vmem:[#allocation5 + $0xc8] sm:$0xff]  ;;  %v325_v28 = vld [vmem:[#allocation5 + $0x150] sm:$0xff]  ;;  %v248_v29 = vld [vmem:[#allocation5 + $0xc0] sm:$0xff] }
  0x20   :  { %333 = vmatpush.msra.mxu0 %v328_v15  ;;  %v232_v25 = vld [vmem:[#allocation5 + $0x48] sm:$0xff]  ;;  %v230_v30 = vld [vmem:[#allocation5 + $0x38] sm:$0xff]  ;;  %v1110_v31 = vld [vmem:[#allocation8 + $0x10] sm:$0xff] }
  0x21   :  { %257 = vmatpush.msrb.mxu2 %v254_v10  ;;  %289 = vmatpush.msra.mxu3 %v234_v17  ;;  %v1112_v32 = vld [vmem:[#allocation8 + $0x30] sm:$0xff]  ;;  %v247_v33 = vld [vmem:[#allocation5 + $0xb8] sm:$0xff]  ;;  %v324_v35 = vld [vmem:[#allocation5 + $0x148] sm:$0xff] }
  0x22   :  { %334 = vmatpush.msra.mxu0 %v327_v22  ;;  %v229_v34 = vld [vmem:[#allocation5 + $0x30] sm:$0xff]  ;;  %v228_v37 = vld [vmem:[#allocation5 + $0x28] sm:$0xff]  ;;  %v323_v38 = vld [vmem:[#allocation5 + $0x140] sm:$0xff] }
  0x23   :  { %258 = vmatpush.msrb.mxu2 %v253_v13  ;;  %290 = vmatpush.msra.mxu3 %v233_v21  ;;  %v246_v36 = vld [vmem:[#allocation5 + $0xb0] sm:$0xff]  ;;  %v245_v39 = vld [vmem:[#allocation5 + $0xa8] sm:$0xff]  ;;  %v227_v40 = vld [vmem:[#allocation5 + $0x20] sm:$0xff] }
  0x24   :  { %335 = vmatpush.msra.mxu0 %v326_v27  ;;  %v322_v41 = vld [vmem:[#allocation5 + $0x138] sm:$0xff]  ;;  %v244_v42 = vld [vmem:[#allocation5 + $0xa0] sm:$0xff]  ;;  %v225_v47 = vld [vmem:[#allocation5 + $0x10] sm:$0xff] }
  0x25   :  { %259 = vmatpush.msrb.mxu2 %v252_v16  ;;  %291 = vmatpush.msra.mxu3 %v232_v25  ;;  %v226_v43 = vld [vmem:[#allocation5 + $0x18] sm:$0xff]  ;;  %v321_v48 = vld [vmem:[#allocation5 + $0x130] sm:$0xff]  ;;  %v224_v50 = vld [vmem:[#allocation5 + $0x8] sm:$0xff] }
  0x26   :  { %803 = vmatmul.msk.f32.gmra.mxu2 %vm140_vm0, %v1102_v18  ;;  %807 = vmatmul.msk.f32.gmra.mxu1 %vm140_vm0, %v1104_v19  ;;  %v1118_v44 = vld [vmem:[#allocation8 + $0x18] sm:$0xff]  ;;  %v242_v49 = vld [vmem:[#allocation5 + $0x90] sm:$0xff]  ;;  %v320_v51 = vld [vmem:[#allocation5 + $0x128] sm:$0xff] }
  0x27   :  { %260 = vmatpush.msrb.mxu2 %v251_v20  ;;  %292 = vmatpush.msra.mxu3 %v231_v26  ;;  %v1120_v45 = vld [vmem:[#allocation8 + $0x38] sm:$0xff]  ;;  %v241_v52 = vld [vmem:[#allocation5 + $0x88] sm:$0xff]  ;;  %v240_v53 = vld [vmem:[#allocation5 + $0x80] sm:$0xff] }
  0x28   :  { %336 = vmatpush.msra.mxu0 %v325_v28  ;;  %v243_v46 = vld [vmem:[#allocation5 + $0x98] sm:$0xff]  ;;  %v223_v54 = vld [vmem:[#allocation5] sm:$0xff]  ;;  %v317_v57 = vld [vmem:[#allocation5 + $0x110] sm:$0xff] }
  0x29   :  { %261 = vmatpush.msrb.mxu2 %v250_v23  ;;  %293 = vmatpush.msra.mxu3 %v230_v30  ;;  %v319_v55 = vld [vmem:[#allocation5 + $0x120] sm:$0xff]  ;;  %v318_v56 = vld [vmem:[#allocation5 + $0x118] sm:$0xff]  ;;  %v316_v58 = vld [vmem:[#allocation5 + $0x108] sm:$0xff] }
  0x2a   :  { %337 = vmatpush.msra.mxu0 %v324_v35  ;;  %v315_v59 = vld [vmem:[#allocation5 + $0x100] sm:$0xff]  ;;  %v1146_v10 = vld [vmem:[#allocation10 + $0x58] sm:$0xff]  ;;  %v1150_v11 = vld [vmem:[#allocation10 + $0x50] sm:$0xff] }
  0x2b   :  { %262 = vmatpush.msrb.mxu2 %v249_v24  ;;  %294 = vmatpush.msra.mxu3 %v229_v34  ;;  %v1142_v9 = vld [vmem:[#allocation10 + $0x60] sm:$0xff]  ;;  %v1154_v12 = vld [vmem:[#allocation10 + $0x48] sm:$0xff]  ;;  %v1162_v16 = vld [vmem:[#allocation10 + $0x38] sm:$0xff] }
  0x2c   :  { %338 = vmatpush.msra.mxu0 %v323_v38  ;;  %v1158_v14 = vld [vmem:[#allocation10 + $0x40] sm:$0xff]  ;;  %v1166_v17 = vld [vmem:[#allocation10 + $0x30] sm:$0xff]  ;;  %v1170_v20 = vld [vmem:[#allocation10 + $0x28] sm:$0xff] }
  0x2d   :  { %263 = vmatpush.msrb.mxu2 %v248_v29  ;;  %295 = vmatpush.msra.mxu3 %v228_v37  ;;  %v1174_v22 = vld [vmem:[#allocation10 + $0x20] sm:$0xff]  ;;  %v1178_v24 = vld [vmem:[#allocation10 + $0x18] sm:$0xff]  ;;  %v1180_v25 = vld [vmem:[#allocation10 + $0x10] sm:$0xff] }
  0x2e   :  { %804 = vmatmul.msk.f32.gmra.mxu2 %vm140_vm0, %v1110_v31  ;;  %808 = vmatmul.msk.f32.gmra.mxu1 %vm140_vm0, %v1112_v32  ;;  %v1184_v27 = vld [vmem:[#allocation10 + $0x8] sm:$0xff]  ;;  %v1188_v28 = vld [vmem:[#allocation10] sm:$0xff] }
  0x2f   :  { %264 = vmatpush.msrb.mxu2 %v247_v33  ;;  %296 = vmatpush.msra.mxu3 %v227_v40 }
  0x30   :  { %339 = vmatpush.msra.mxu0 %v322_v41 }
  0x31   :  { %265 = vmatpush.msrb.mxu2 %v246_v36  ;;  %297 = vmatpush.msra.mxu3 %v226_v43 }
  0x32   :  { %340 = vmatpush.msra.mxu0 %v321_v48 }
  0x33   :  { %266 = vmatpush.msrb.mxu2 %v245_v39  ;;  %298 = vmatpush.msra.mxu3 %v225_v47 }
  0x34   :  { %341 = vmatpush.msra.mxu0 %v320_v51 }
  0x35   :  { %267 = vmatpush.msrb.mxu2 %v244_v42  ;;  %299 = vmatpush.msra.mxu3 %v224_v50 }
  0x36   :  { %805 = vmatmul.msk.f32.gmra.mxu2 %vm140_vm0, %v1118_v44  ;;  %809 = vmatmul.msk.f32.gmra.mxu1 %vm140_vm0, %v1120_v45 }
  0x37   :  { %268 = vmatpush.msrb.mxu2 %v243_v46  ;;  %300 = vmatpush.msra.mxu3 %v223_v54 }
  0x38   :  { %342 = vmatpush.msra.mxu0 %v319_v55 }
  0x39   :  { %269 = vmatpush.msrb.mxu2 %v242_v49 }
  0x3a   :  { %343 = vmatpush.msra.mxu0 %v318_v56 }
  0x3b   :  { %270 = vmatpush.msrb.mxu2 %v241_v52 }
  0x3c   :  { %344 = vmatpush.msra.mxu0 %v317_v57 }
  0x3d   :  { %271 = vmatpush.msrb.mxu2 %v240_v53 }
  0x3e   :  { %272 = vmatmul.f32.vlgmr.msrb.gmra.mxu2 %v1088_v3  ;;  %345 = vmatpush.msra.mxu0 %v316_v58 }
  0x40   :  { %346 = vmatpush.msra.mxu0 %v315_v59 }
  0x46   :  { %275 = vmatmul.f32.gmra.mxu2 %v1084_v2  ;;  %v1130_v2 = vld [vmem:[#allocation10 + $0x78] sm:$0xff] }
  0x47   :  { %375 = vmatpush.msrb.mxu1 %v1130_v2  ;;  %414 = vmatpush.msrb.mxu3 %v1130_v2 }
  0x4e   :  { %278 = vmatmul.f32.gmra.mxu2 %v1080_v1  ;;  %v1138_v1 = vld [vmem:[#allocation10 + $0x68] sm:$0xff] }
  0x56   :  { %281 = vmatmul.f32.gmra.mxu2 %v1078_v0  ;;  %v1134_v0 = vld [vmem:[#allocation10 + $0x70] sm:$0xff] }
  0x57   :  { %376 = vmatpush.msrb.mxu1 %v1134_v0  ;;  %415 = vmatpush.msrb.mxu3 %v1134_v0 }
  0x59   :  { %377 = vmatpush.msrb.mxu1 %v1138_v1  ;;  %416 = vmatpush.msrb.mxu3 %v1138_v1 }
  0x5b   :  { %378 = vmatpush.msrb.mxu1 %v1142_v9  ;;  %417 = vmatpush.msrb.mxu3 %v1142_v9 }
  0x5d   :  { %379 = vmatpush.msrb.mxu1 %v1146_v10  ;;  %418 = vmatpush.msrb.mxu3 %v1146_v10 }
  0x5f   :  { %380 = vmatpush.msrb.mxu1 %v1150_v11  ;;  %419 = vmatpush.msrb.mxu3 %v1150_v11 }
  0x61   :  { %381 = vmatpush.msrb.mxu1 %v1154_v12  ;;  %420 = vmatpush.msrb.mxu3 %v1154_v12 }
  0x63   :  { %382 = vmatpush.msrb.mxu1 %v1158_v14  ;;  %421 = vmatpush.msrb.mxu3 %v1158_v14 }
  0x65   :  { %383 = vmatpush.msrb.mxu1 %v1162_v16  ;;  %422 = vmatpush.msrb.mxu3 %v1162_v16 }
  0x67   :  { %384 = vmatpush.msrb.mxu1 %v1166_v17  ;;  %423 = vmatpush.msrb.mxu3 %v1166_v17 }
  0x69   :  { %385 = vmatpush.msrb.mxu1 %v1170_v20  ;;  %424 = vmatpush.msrb.mxu3 %v1170_v20 }
  0x6b   :  { %386 = vmatpush.msrb.mxu1 %v1174_v22  ;;  %425 = vmatpush.msrb.mxu3 %v1174_v22 }
  0x6d   :  { %387 = vmatpush.msrb.mxu1 %v1178_v24  ;;  %426 = vmatpush.msrb.mxu3 %v1178_v24 }
  0x6f   :  { %388 = vmatpush.msrb.mxu1 %v1180_v25  ;;  %427 = vmatpush.msrb.mxu3 %v1180_v25 }
  0x71   :  { %389 = vmatpush.msrb.mxu1 %v1184_v27  ;;  %428 = vmatpush.msrb.mxu3 %v1184_v27 }
  0x73   :  { %390 = vmatpush.msrb.mxu1 %v1188_v28  ;;  %429 = vmatpush.msrb.mxu3 %v1188_v28 }
  0x9b   :  { %v211_v60 = vpop.f32.mrf.mxu1 }
  0x9c   :  { %347 = vmatmul.f32.vlgmr.msra.gmra.mxu0 %v211_v60 }
  0xa1   :  { %v170_v61 = vpop.f32.mrf.mxu2 }
  0xa2   :  { %301 = vmatmul.f32.vlgmr.msra.gmra.mxu3 %v170_v61 }
  0xa3   :  { %v214_v62 = vpop.f32.mrf.mxu1 }
  0xa4   :  { %350 = vmatmul.f32.gmra.mxu0 %v214_v62 }
  0xa9   :  { %v173_v63 = vpop.f32.mrf.mxu2 }
  0xaa   :  { %304 = vmatmul.f32.gmra.mxu3 %v173_v63 }
  0xab   :  { %v217_v3 = vpop.f32.mrf.mxu1 }
  0xac   :  { %353 = vmatmul.f32.gmra.mxu0 %v217_v3 }
  0xb1   :  { %v176_v4 = vpop.f32.mrf.mxu2 }
  0xb2   :  { %307 = vmatmul.f32.gmra.mxu3 %v176_v4 }
  0xb3   :  { %v220_v7 = vpop.f32.mrf.mxu1 }
  0xb4   :  { %356 = vmatmul.f32.gmra.mxu0 %v220_v7 }
  0xb9   :  { %v179_v8 = vpop.f32.mrf.mxu2 }
  0xba   :  { %310 = vmatmul.f32.gmra.mxu3 %v179_v8 }
  0xc1   :  { %v273_v13 = vpop.f32.mrf.mxu2 }
  0xc9   :  { %v276_v23 = vpop.f32.mrf.mxu2 }
  0xd1   :  { %v279_v30 = vpop.f32.mrf.mxu2 }
  0xd9   :  { %v282_v39 = vpop.f32.mrf.mxu2 }
 0x119   :  { %v348_v15 = vpop.f32.mrf.mxu0 }
 0x121   :  { %v351_v26 = vpop.f32.mrf.mxu0 }
 0x125   :  { %v302_v21 = vpop.f32.mrf.mxu3 }
 0x126   :  { %v303_v36 = vadd.f32 %v302_v21, %v273_v13 }
 0x128   :  { %v360_v40 = vadd.f32 %v348_v15, %v303_v36  ;;  %v558_v36 = vld [vmem:[#allocation7 + $0xf0] sm:$0xff] }
 0x129   :  { %v354_v33 = vpop.f32.mrf.mxu0 }
 0x12d   :  { %v305_v29 = vpop.f32.mrf.mxu3 }
 0x12e   :  { %v306_v35 = vadd.f32 %v305_v29, %v276_v23 }
 0x130   :  { %v361_v38 = vadd.f32 %v351_v26, %v306_v35  ;;  %v559_v35 = vld [vmem:[#allocation7 + $0xf8] sm:$0xff] }
 0x131   :  { %v357_v43 = vpop.f32.mrf.mxu0  ;;  %560 = vmatpush.msrb.mxu0 %v559_v35 }
 0x132   :  { %v366_v46 = vadd.f32 %v361_v38, %v360_v40 }
 0x133   :  { %561 = vmatpush.msrb.mxu0 %v558_v36 }
 0x135   :  { %v308_v34 = vpop.f32.mrf.mxu3 }
 0x136   :  { %v309_v37 = vadd.f32 %v308_v34, %v279_v30 }
 0x138   :  { %v362_v41 = vadd.f32 %v354_v33, %v309_v37  ;;  %v557_v37 = vld [vmem:[#allocation7 + $0xe8] sm:$0xff] }
 0x139   :  { %562 = vmatpush.msrb.mxu0 %v557_v37 }
 0x13a   :  { %v367_v48 = vadd.f32 %v366_v46, %v362_v41  ;;  %v550_v46 = vld [vmem:[#allocation7 + $0xb0] sm:$0xff] }
 0x13d   :  { %v311_v42 = vpop.f32.mrf.mxu3 }
 0x13e   :  { %v312_v47 = vadd.f32 %v311_v42, %v282_v39  ;;  %v555_v39 = vld [vmem:[#allocation7 + $0xd8] sm:$0xff]  ;;  %v552_v42 = vld [vmem:[#allocation7 + $0xc0] sm:$0xff] }
 0x140   :  { %v363_v49 = vadd.f32 %v357_v43, %v312_v47  ;;  %v551_v43 = vld [vmem:[#allocation7 + $0xb8] sm:$0xff]  ;;  %v549_v47 = vld [vmem:[#allocation7 + $0xa8] sm:$0xff] }
 0x142   :  { %v368_v50 = vadd.f32 %v367_v48, %v363_v49  ;;  %v548_v48 = vld [vmem:[#allocation7 + $0xa0] sm:$0xff] }
 0x144   :  { %v369_v51 = vrot.slane %v368_v50, 4 }
 0x146   :  { %v370_v52 = vadd.f32 %v369_v51, %v368_v50  ;;  %v546_v50 = vld [vmem:[#allocation7 + $0x90] sm:$0xff]  ;;  %v545_v51 = vld [vmem:[#allocation7 + $0x88] sm:$0xff] }
 0x148   :  { %v371_v53 = vrot.slane %v370_v52, 2 }
 0x14a   :  { %v372_v54 = vadd.f32 %v371_v53, %v370_v52  ;;  %v544_v52 = vld [vmem:[#allocation7 + $0x80] sm:$0xff] }
 0x14c   :  { %v373_v55 = vrot.slane %v372_v54, 1 }
 0x14e   :  { %v374_v56 = vadd.f32 %v373_v55, %v372_v54 }
 0x150   :  { %391 = vmatmul.f32.vlgmr.msrb.gmra.mxu1 %v374_v56 }
 0x1cd   :  { %v392_v57 = vpop.f32.mrf.mxu1 }
 0x1ce   :  { %v395_v58 = vmul.f32 0.001953125, %v392_v57 }
 0x1d0   :  { %v396_v59 = vperm.slane %v395_v58, 0 }
 0x1d2   :  { %v1194_v60 = vsub.f32 %v360_v40, %v396_v59  ;;  %v1196_v61 = vsub.f32 %v361_v38, %v396_v59  ;;  %v1198_v62 = vsub.f32 %v362_v41, %v396_v59  ;;  %v1200_v63 = vsub.f32 %v363_v49, %v396_v59  ;;  %v556_v38 = vld [vmem:[#allocation7 + $0xe0] sm:$0xff]  ;;  %v554_v40 = vld [vmem:[#allocation7 + $0xd0] sm:$0xff]  ;;  %v553_v41 = vld [vmem:[#allocation7 + $0xc8] sm:$0xff] }
 0x1d3   :  { %563 = vmatpush.msrb.mxu0 %v556_v38  ;;  %v547_v49 = vld [vmem:[#allocation7 + $0x98] sm:$0xff] }
 0x1d4   :  { %v401_v3 = vmul.f32 %v1194_v60, %v1194_v60  ;;  %v402_v4 = vmul.f32 %v1196_v61, %v1196_v61  ;;  %v403_v7 = vmul.f32 %v1198_v62, %v1198_v62  ;;  %v404_v13 = vmul.f32 %v1200_v63, %v1200_v63 }
 0x1d5   :  { %564 = vmatpush.msrb.mxu0 %v555_v39 }
 0x1d6   :  { %v405_v8 = vadd.f32 %v402_v4, %v401_v3 }
 0x1d7   :  { %565 = vmatpush.msrb.mxu0 %v554_v40  ;;  %v633_v40 = vld [vmem:[#allocation7 + $0x170] sm:$0xff] }
 0x1d8   :  { %v406_v15 = vadd.f32 %v405_v8, %v403_v7 }
 0x1d9   :  { %566 = vmatpush.msrb.mxu0 %v553_v41 }
 0x1da   :  { %v407_v21 = vadd.f32 %v406_v15, %v404_v13  ;;  %v826_v13 = vld [vmem:[%s1290_s5] ss:$0 sm:$0xff] }
 0x1db   :  { %567 = vmatpush.msrb.mxu0 %v552_v42  ;;  %v632_v42 = vld [vmem:[#allocation7 + $0x168] sm:$0xff] }
 0x1dc   :  { %v408_v23 = vrot.slane %v407_v21, 4 }
 0x1dd   :  { %568 = vmatpush.msrb.mxu0 %v551_v43  ;;  %v542_v43 = vld [vmem:[#allocation7 + $0x78] sm:$0xff] }
 0x1de   :  { %v409_v26 = vadd.f32 %v408_v23, %v407_v21  ;;  %v827_v21 = vld [vmem:[%s1291_s6] ss:$0 sm:$0xff] }
 0x1df   :  { %569 = vmatpush.msrb.mxu0 %v550_v46  ;;  %v631_v46 = vld [vmem:[#allocation7 + $0x160] sm:$0xff] }
 0x1e0   :  { %v410_v29 = vrot.slane %v409_v26, 2 }
 0x1e1   :  { %570 = vmatpush.msrb.mxu0 %v549_v47  ;;  %v541_v47 = vld [vmem:[#allocation7 + $0x70] sm:$0xff] }
 0x1e2   :  { %v411_v30 = vadd.f32 %v410_v29, %v409_v26 }
 0x1e3   :  { %571 = vmatpush.msrb.mxu0 %v548_v48  ;;  %v630_v48 = vld [vmem:[#allocation7 + $0x158] sm:$0xff] }
 0x1e4   :  { %v412_v33 = vrot.slane %v411_v30, 1 }
 0x1e5   :  { %572 = vmatpush.msrb.mxu0 %v547_v49  ;;  %v540_v49 = vld [vmem:[#allocation7 + $0x68] sm:$0xff] }
 0x1e6   :  { %v413_v34 = vadd.f32 %v412_v33, %v411_v30 }
 0x1e7   :  { %573 = vmatpush.msrb.mxu0 %v546_v50  ;;  %v629_v50 = vld [vmem:[#allocation7 + $0x150] sm:$0xff] }
 0x1e8   :  { %430 = vmatmul.f32.vlgmr.msrb.gmra.mxu3 %v413_v34 }
 0x1e9   :  { %574 = vmatpush.msrb.mxu0 %v545_v51  ;;  %v539_v51 = vld [vmem:[#allocation7 + $0x60] sm:$0xff] }
 0x1eb   :  { %575 = vmatpush.msrb.mxu0 %v544_v52  ;;  %v628_v52 = vld [vmem:[#allocation7 + $0x148] sm:$0xff] }
 0x1ed   :  { %718 = vmatpush.msra.mxu0 %v1130_v2 }
 0x1ef   :  { %719 = vmatpush.msra.mxu0 %v1134_v0 }
 0x1f1   :  { %720 = vmatpush.msra.mxu0 %v1138_v1 }
 0x1f3   :  { %721 = vmatpush.msra.mxu0 %v1142_v9 }
 0x1f5   :  { %722 = vmatpush.msra.mxu0 %v1146_v10 }
 0x1f7   :  { %723 = vmatpush.msra.mxu0 %v1150_v11 }
 0x1f9   :  { %724 = vmatpush.msra.mxu0 %v1154_v12 }
 0x1fb   :  { %725 = vmatpush.msra.mxu0 %v1158_v14 }
 0x1fd   :  { %726 = vmatpush.msra.mxu0 %v1162_v16 }
 0x1ff   :  { %727 = vmatpush.msra.mxu0 %v1166_v17 }
 0x201   :  { %728 = vmatpush.msra.mxu0 %v1170_v20 }
 0x203   :  { %729 = vmatpush.msra.mxu0 %v1174_v22 }
 0x205   :  { %730 = vmatpush.msra.mxu0 %v1178_v24 }
 0x207   :  { %731 = vmatpush.msra.mxu0 %v1180_v25 }
 0x209   :  { %732 = vmatpush.msra.mxu0 %v1184_v27 }
 0x20b   :  { %733 = vmatpush.msra.mxu0 %v1188_v28 }
 0x26b   :  { %v431_v53 = vpop.f32.mrf.mxu3 }
 0x26c   :  { %v434_v54 = vmul.f32 0.001953125, %v431_v53  ;;  %v627_v53 = vld [vmem:[#allocation7 + $0x140] sm:$0xff] }
 0x26e   :  { %v435_v55 = vadd.f32 1e-05, %v434_v54  ;;  %v535_v54 = vld [vmem:[#allocation7 + $0x40] sm:$0xff] }
 0x270   :  { %830 = vrsqrt.f32 %v435_v55  ;;  %vm442_vm2 = vweird.f32 %v435_v55 }
 0x276   :  { %v831_v56 = vpop.eup %830 }
 0x277   :  { %v437_v57 = vmul.f32 %v831_v56, %v435_v55  ;;  %vm443_vm1 = vweird.f32 %v831_v56 }
 0x278   :  { %vm444_vm3 = vmor %vm442_vm2, %vm443_vm1 }
 0x279   :  { %v438_v58 = vmul.f32 %v831_v56, %v437_v57 }
 0x27b   :  { %v439_v59 = vmul.f32 0.5, %v438_v58 }
 0x27d   :  { %v440_v3 = vsub.f32 1.5, %v439_v59 }
 0x27f   :  { %v441_v4 = vmul.f32 %v831_v56, %v440_v3 }
 0x281   :  { %v445_v7 = vsel %vm444_vm3, %v831_v56, %v441_v4 }
 0x282   :  { %v446_v8 = vperm.slane %v445_v7, 0 }
 0x284   :  { %v450_v15 = vmul.f32 %v446_v8, %v1200_v63  ;;  %v447_v23 = vmul.f32 %v446_v8, %v1194_v60  ;;  %v449_v26 = vmul.f32 %v446_v8, %v1198_v62  ;;  %v448_v29 = vmul.f32 %v446_v8, %v1196_v61  ;;  %v634_v62 = vld [vmem:[#allocation7 + $0x178] sm:$0xff] }
 0x285   :  { %635 = vmatpush.msra.mxu2 %v634_v62 }
 0x286   :  { %v457_v30 = vmul.f32 %v826_v13, %v450_v15  ;;  %v454_v33 = vmul.f32 %v826_v13, %v447_v23  ;;  %v456_v34 = vmul.f32 %v826_v13, %v449_v26  ;;  %v455_v35 = vmul.f32 %v826_v13, %v448_v29 }
 0x287   :  { %636 = vmatpush.msra.mxu2 %v633_v40 }
 0x288   :  { %v464_v36 = vadd.f32 %v827_v21, %v457_v30  ;;  %v461_v63 = vadd.f32 %v827_v21, %v454_v33  ;;  %v463_v37 = vadd.f32 %v827_v21, %v456_v34  ;;  %v462_v39 = vadd.f32 %v827_v21, %v455_v35 }
 0x289   :  { %637 = vmatpush.msra.mxu2 %v632_v42 }
 0x28a   :  { %v1235_v38 = vmax.f32 %v464_v36, 0.0  ;;  %v465_v60 = vmax.f32 %v461_v63, 0.0  ;;  %v467_v61 = vmax.f32 %v463_v37, 0.0  ;;  %v466_v41 = vmax.f32 %v462_v39, 0.0 }
 0x28b   :  { %638 = vmatpush.msra.mxu2 %v631_v46 }
 0x28c   :  { %481 = vmatpush.msra.mxu1 %v1235_v38  ;;  %510 = vmatpush.msra.mxu3 %v1235_v38 }
 0x28d   :  { %576 = vmatmul.f32.vlgmr.msrb.gmra.mxu0 %v465_v60  ;;  %639 = vmatpush.msra.mxu2 %v630_v48 }
 0x28e   :  { %482 = vmatpush.msra.mxu1 %v467_v61  ;;  %511 = vmatpush.msra.mxu3 %v467_v61 }
 0x28f   :  { %640 = vmatpush.msra.mxu2 %v629_v50 }
 0x290   :  { %483 = vmatpush.msra.mxu1 %v466_v41  ;;  %512 = vmatpush.msra.mxu3 %v466_v41 }
 0x291   :  { %641 = vmatpush.msra.mxu2 %v628_v52 }
 0x292   :  { %484 = vmatpush.msra.mxu1 %v465_v60  ;;  %513 = vmatpush.msra.mxu3 %v465_v60 }
 0x293   :  { %810 = vmatmul.msk.f32.vlgmr.msra.gmra.mxu1 %vm140_vm0, %v1091_v5  ;;  %814 = vmatmul.msk.f32.vlgmr.msra.gmra.mxu3 %vm140_vm0, %v1094_v6  ;;  %v538_v5 = vld [vmem:[#allocation7 + $0x58] sm:$0xff]  ;;  %v537_v6 = vld [vmem:[#allocation7 + $0x50] sm:$0xff] }
 0x294   :  { %589 = vmatpush.msrb.mxu1 %v542_v43  ;;  %679 = vmatpush.msrb.mxu3 %v1130_v2  ;;  %v626_v2 = vld [vmem:[#allocation7 + $0x138] sm:$0xff] }
 0x295   :  { %579 = vmatmul.f32.gmra.mxu0 %v466_v41  ;;  %642 = vmatpush.msra.mxu2 %v627_v53 }
 0x296   :  { %590 = vmatpush.msrb.mxu1 %v541_v47  ;;  %680 = vmatpush.msrb.mxu3 %v1134_v0  ;;  %v536_v0 = vld [vmem:[#allocation7 + $0x48] sm:$0xff] }
 0x297   :  { %643 = vmatpush.msra.mxu2 %v626_v2 }
 0x298   :  { %591 = vmatpush.msrb.mxu1 %v540_v49  ;;  %681 = vmatpush.msrb.mxu3 %v1138_v1  ;;  %v534_v1 = vld [vmem:[#allocation7 + $0x38] sm:$0xff] }
 0x29a   :  { %592 = vmatpush.msrb.mxu1 %v539_v51  ;;  %682 = vmatpush.msrb.mxu3 %v1142_v9  ;;  %v531_v9 = vld [vmem:[#allocation7 + $0x20] sm:$0xff] }
 0x29b   :  { %811 = vmatmul.msk.f32.gmra.mxu1 %vm140_vm0, %v1102_v18  ;;  %815 = vmatmul.msk.f32.gmra.mxu3 %vm140_vm0, %v1104_v19  ;;  %v533_v18 = vld [vmem:[#allocation7 + $0x30] sm:$0xff]  ;;  %v532_v19 = vld [vmem:[#allocation7 + $0x28] sm:$0xff] }
 0x29c   :  { %593 = vmatpush.msrb.mxu1 %v538_v5  ;;  %683 = vmatpush.msrb.mxu3 %v1146_v10  ;;  %v529_v10 = vld [vmem:[#allocation7 + $0x10] sm:$0xff] }
 0x29d   :  { %582 = vmatmul.f32.gmra.mxu0 %v467_v61 }
 0x29e   :  { %594 = vmatpush.msrb.mxu1 %v537_v6  ;;  %684 = vmatpush.msrb.mxu3 %v1150_v11  ;;  %v528_v11 = vld [vmem:[#allocation7 + $0x8] sm:$0xff] }
 0x2a0   :  { %595 = vmatpush.msrb.mxu1 %v536_v0  ;;  %685 = vmatpush.msrb.mxu3 %v1154_v12  ;;  %v527_v12 = vld [vmem:[#allocation7] sm:$0xff] }
 0x2a2   :  { %596 = vmatpush.msrb.mxu1 %v535_v54  ;;  %686 = vmatpush.msrb.mxu3 %v1158_v14  ;;  %v622_v14 = vld [vmem:[#allocation7 + $0x118] sm:$0xff] }
 0x2a3   :  { %812 = vmatmul.msk.f32.gmra.mxu1 %vm140_vm0, %v1110_v31  ;;  %816 = vmatmul.msk.f32.gmra.mxu3 %vm140_vm0, %v1112_v32  ;;  %v530_v31 = vld [vmem:[#allocation7 + $0x18] sm:$0xff]  ;;  %v625_v32 = vld [vmem:[#allocation7 + $0x130] sm:$0xff] }
 0x2a4   :  { %597 = vmatpush.msrb.mxu1 %v534_v1  ;;  %687 = vmatpush.msrb.mxu3 %v1162_v16  ;;  %v621_v16 = vld [vmem:[#allocation7 + $0x110] sm:$0xff] }
 0x2a5   :  { %585 = vmatmul.f32.gmra.mxu0 %v1235_v38  ;;  %644 = vmatpush.msra.mxu2 %v625_v32 }
 0x2a6   :  { %598 = vmatpush.msrb.mxu1 %v533_v18  ;;  %688 = vmatpush.msrb.mxu3 %v1166_v17  ;;  %v620_v17 = vld [vmem:[#allocation7 + $0x108] sm:$0xff] }
 0x2a8   :  { %599 = vmatpush.msrb.mxu1 %v532_v19  ;;  %689 = vmatpush.msrb.mxu3 %v1170_v20  ;;  %v619_v20 = vld [vmem:[#allocation7 + $0x100] sm:$0xff] }
 0x2aa   :  { %600 = vmatpush.msrb.mxu1 %v531_v9  ;;  %690 = vmatpush.msrb.mxu3 %v1174_v22 }
 0x2ab   :  { %813 = vmatmul.msk.f32.gmra.mxu1 %vm140_vm0, %v1118_v44  ;;  %817 = vmatmul.msk.f32.gmra.mxu3 %vm140_vm0, %v1120_v45  ;;  %v624_v44 = vld [vmem:[#allocation7 + $0x128] sm:$0xff]  ;;  %v623_v45 = vld [vmem:[#allocation7 + $0x120] sm:$0xff] }
 0x2ac   :  { %691 = vmatpush.msrb.mxu3 %v1178_v24  ;;  %601 = vmatpush.msrb.mxu1 %v530_v31 }
 0x2ad   :  { %645 = vmatpush.msra.mxu2 %v624_v44 }
 0x2ae   :  { %692 = vmatpush.msrb.mxu3 %v1180_v25  ;;  %602 = vmatpush.msrb.mxu1 %v529_v10 }
 0x2af   :  { %646 = vmatpush.msra.mxu2 %v623_v45 }
 0x2b0   :  { %693 = vmatpush.msrb.mxu3 %v1184_v27  ;;  %603 = vmatpush.msrb.mxu1 %v528_v11 }
 0x2b1   :  { %647 = vmatpush.msra.mxu2 %v622_v14 }
 0x2b2   :  { %694 = vmatpush.msrb.mxu3 %v1188_v28  ;;  %604 = vmatpush.msrb.mxu1 %v527_v12 }
 0x2b3   :  { %648 = vmatpush.msra.mxu2 %v621_v16 }
 0x2b5   :  { %649 = vmatpush.msra.mxu2 %v620_v17 }
 0x2b7   :  { %650 = vmatpush.msra.mxu2 %v619_v20 }
 0x30a   :  { %v577_v59 = vpop.f32.mrf.mxu0 }
 0x310   :  { %v486_v22 = vpop.f32.mrf.mxu1 }
 0x311   :  { %605 = vmatmul.f32.vlgmr.msrb.gmra.mxu1 %v486_v22 }
 0x312   :  { %v580_v7 = vpop.f32.mrf.mxu0 }
 0x316   :  { %v515_v24 = vpop.f32.mrf.mxu3 }
 0x317   :  { %651 = vmatmul.f32.vlgmr.msra.gmra.mxu2 %v515_v24 }
 0x318   :  { %v489_v25 = vpop.f32.mrf.mxu1 }
 0x319   :  { %608 = vmatmul.f32.gmra.mxu1 %v489_v25 }
 0x31a   :  { %v583_v15 = vpop.f32.mrf.mxu0 }
 0x31e   :  { %v518_v27 = vpop.f32.mrf.mxu3 }
 0x31f   :  { %654 = vmatmul.f32.gmra.mxu2 %v518_v27 }
 0x320   :  { %v492_v28 = vpop.f32.mrf.mxu1 }
 0x321   :  { %611 = vmatmul.f32.gmra.mxu1 %v492_v28  ;;  %v828_v28 = vld [vmem:[%s1292_s7] ss:$0 sm:$0xff]  ;;  %s997_s7 = smov [#allocation11]  }
 0x322   :  { %v586_v36 = vpop.f32.mrf.mxu0 }
 0x326   :  { %v521_v55 = vpop.f32.mrf.mxu3 }
 0x327   :  { %657 = vmatmul.f32.gmra.mxu2 %v521_v55 }
 0x328   :  { %v495_v56 = vpop.f32.mrf.mxu1 }
 0x329   :  { %614 = vmatmul.f32.gmra.mxu1 %v495_v56 }
 0x32e   :  { %v524_v57 = vpop.f32.mrf.mxu3 }
 0x32f   :  { %660 = vmatmul.f32.gmra.mxu2 %v524_v57 }
 0x38e   :  { %v606_v58 = vpop.f32.mrf.mxu1 }
 0x38f   :  { %v607_v26 = vadd.f32 %v606_v58, %v577_v59  ;;  %v829_v59 = vld [vmem:[%s1293_s8] ss:$0 sm:$0xff]  ;;  %s785_s8 = sshll.u32 %s997_s7, 4  ;;  %s786_s8 = int_to_ptr.vmem [resolvable:$true] %s785_s8 }
 0x396   :  { %v609_v3 = vpop.f32.mrf.mxu1 }
 0x397   :  { %v610_v23 = vadd.f32 %v609_v3, %v580_v7 }
 0x39a   :  { %v652_v4 = vpop.f32.mrf.mxu2 }
 0x39b   :  { %v664_v34 = vadd.f32 %v652_v4, %v607_v26  ;;  %v834_v26 = vld [vmem:[#allocation2] sm:$0xff] }
 0x39e   :  { %v612_v13 = vpop.f32.mrf.mxu1 }
 0x39f   :  { %v613_v29 = vadd.f32 %v612_v13, %v583_v15 }
 0x3a2   :  { %v655_v8 = vpop.f32.mrf.mxu2 }
 0x3a3   :  { %v665_v30 = vadd.f32 %v655_v8, %v610_v23 }
 0x3a5   :  { %v670_v63 = vadd.f32 %v665_v30, %v664_v34 }
 0x3a6   :  { %v615_v33 = vpop.f32.mrf.mxu1 }
 0x3a7   :  { %v616_v37 = vadd.f32 %v615_v33, %v586_v36  ;;  %v837_v36 = vld [vmem:[#allocation2 + $0x18] sm:$0xff] }
 0x3aa   :  { %v658_v21 = vpop.f32.mrf.mxu2 }
 0x3ab   :  { %v666_v35 = vadd.f32 %v658_v21, %v613_v29 }
 0x3ad   :  { %v671_v60 = vadd.f32 %v670_v63, %v666_v35 }
 0x3b2   :  { %v661_v38 = vpop.f32.mrf.mxu2 }
 0x3b3   :  { %v667_v39 = vadd.f32 %v661_v38, %v616_v37 }
 0x3b5   :  { %v672_v61 = vadd.f32 %v671_v60, %v667_v39 }
 0x3b7   :  { %v673_v62 = vrot.slane %v672_v61, 4 }
 0x3b9   :  { %v674_v40 = vadd.f32 %v673_v62, %v672_v61 }
 0x3bb   :  { %v675_v41 = vrot.slane %v674_v40, 2 }
 0x3bd   :  { %v676_v42 = vadd.f32 %v675_v41, %v674_v40 }
 0x3bf   :  { %v677_v43 = vrot.slane %v676_v42, 1 }
 0x3c1   :  { %v678_v46 = vadd.f32 %v677_v43, %v676_v42 }
 0x3c3   :  { %695 = vmatmul.f32.vlgmr.msrb.gmra.mxu3 %v678_v46 }
 0x446   :  { %v696_v47 = vpop.f32.mrf.mxu3 }
 0x447   :  { %v699_v48 = vmul.f32 0.001953125, %v696_v47 }
 0x449   :  { %v700_v49 = vperm.slane %v699_v48, 0 }
 0x44b   :  { %v701_v50 = vsub.f32 %v664_v34, %v700_v49  ;;  %v702_v51 = vsub.f32 %v665_v30, %v700_v49  ;;  %v703_v52 = vsub.f32 %v666_v35, %v700_v49  ;;  %v704_v5 = vsub.f32 %v667_v39, %v700_v49  ;;  %v835_v30 = vld [vmem:[#allocation2 + $0x8] sm:$0xff]  ;;  %v836_v34 = vld [vmem:[#allocation2 + $0x10] sm:$0xff] }
 0x44d   :  { %v705_v53 = vmul.f32 %v701_v50, %v701_v50  ;;  %v706_v6 = vmul.f32 %v702_v51, %v702_v51  ;;  %v707_v2 = vmul.f32 %v703_v52, %v703_v52  ;;  %v708_v54 = vmul.f32 %v704_v5, %v704_v5 }
 0x44f   :  { %v709_v0 = vadd.f32 %v706_v6, %v705_v53 }
 0x451   :  { %v710_v1 = vadd.f32 %v709_v0, %v707_v2 }
 0x453   :  { %v711_v18 = vadd.f32 %v710_v1, %v708_v54 }
 0x455   :  { %v712_v19 = vrot.slane %v711_v18, 4 }
 0x457   :  { %v713_v9 = vadd.f32 %v712_v19, %v711_v18 }
 0x459   :  { %v714_v31 = vrot.slane %v713_v9, 2 }
 0x45b   :  { %v715_v32 = vadd.f32 %v714_v31, %v713_v9 }
 0x45d   :  { %v716_v10 = vrot.slane %v715_v32, 1 }
 0x45f   :  { %v717_v44 = vadd.f32 %v716_v10, %v715_v32 }
 0x461   :  { %734 = vmatmul.f32.vlgmr.msra.gmra.mxu0 %v717_v44 }
 0x4de   :  { %v735_v11 = vpop.f32.mrf.mxu0 }
 0x4df   :  { %v738_v45 = vmul.f32 0.001953125, %v735_v11 }
 0x4e1   :  { %v739_v12 = vadd.f32 1e-05, %v738_v45 }
 0x4e3   :  { %832 = vrsqrt.f32 %v739_v12  ;;  %vm746_vm5 = vweird.f32 %v739_v12 }
 0x4e9   :  { %v833_v14 = vpop.eup %832 }
 0x4ea   :  { %v741_v16 = vmul.f32 %v833_v14, %v739_v12  ;;  %vm747_vm4 = vweird.f32 %v833_v14 }
 0x4eb   :  { %vm748_vm6 = vmor %vm746_vm5, %vm747_vm4 }
 0x4ec   :  { %v742_v17 = vmul.f32 %v833_v14, %v741_v16 }
 0x4ee   :  { %v743_v20 = vmul.f32 0.5, %v742_v17 }
 0x4f0   :  { %v744_v22 = vsub.f32 1.5, %v743_v20 }
 0x4f2   :  { %v745_v24 = vmul.f32 %v833_v14, %v744_v22 }
 0x4f4   :  { %v749_v25 = vsel %vm748_vm6, %v833_v14, %v745_v24 }
 0x4f5   :  { %v750_v27 = vperm.slane %v749_v25, 0 }
 0x4f7   :  { %v751_v55 = vmul.f32 %v750_v27, %v701_v50  ;;  %v752_v56 = vmul.f32 %v750_v27, %v702_v51  ;;  %v753_v57 = vmul.f32 %v750_v27, %v703_v52  ;;  %v754_v58 = vmul.f32 %v750_v27, %v704_v5 }
 0x4f9   :  { %v758_v3 = vmul.f32 %v828_v28, %v751_v55  ;;  %v759_v4 = vmul.f32 %v828_v28, %v752_v56  ;;  %v760_v7 = vmul.f32 %v828_v28, %v753_v57  ;;  %v761_v8 = vmul.f32 %v828_v28, %v754_v58 }
 0x4fb   :  { %v765_v13 = vadd.f32 %v829_v59, %v758_v3  ;;  %v766_v15 = vadd.f32 %v829_v59, %v759_v4  ;;  %v767_v21 = vadd.f32 %v829_v59, %v760_v7  ;;  %v768_v23 = vadd.f32 %v829_v59, %v761_v8 }
 0x4fd   :  { %v769_v29 = vadd.f32 %v834_v26, %v765_v13  ;;  %v770_v33 = vadd.f32 %v835_v30, %v766_v15  ;;  %v771_v35 = vadd.f32 %v836_v34, %v767_v21  ;;  %v772_v63 = vadd.f32 %v837_v36, %v768_v23 }
 0x4ff   :  { %v773_v37 = vmax.f32 %v769_v29, 0.0  ;;  %v774_v38 = vmax.f32 %v770_v33, 0.0  ;;  %v775_v60 = vmax.f32 %v771_v35, 0.0  ;;  %v776_v39 = vmax.f32 %v772_v63, 0.0 }
 0x501   :  { %777 = vst [vmem:[#allocation11] sm:$0xff] %v773_v37 }
 0x502   :  { %778 = vst [vmem:[#allocation11 + $0x8] sm:$0xff] %v774_v38 }
 0x503   :  { %779 = vst [vmem:[#allocation11 + $0x10] sm:$0xff] %v775_v60 }
 0x504   :  { %780 = vst [vmem:[#allocation11 + $0x18] sm:$0xff] %v776_v39 }
 0x505   :  { %793 = dma.vmem_to_hbm [thread:$0]  %s786_s8, 512, %s788_s20, [#allocation4], %s991_s17, %s991_s17, %s992_s18  }
 0x506   :  { %988 = dma.done.wait [#allocation4], 512  }
 0x507   :  { %989 = vsyncadd [#allocation4], 4294966784 }
 0x508   :  { %798 = vsyncpa [#allocation3], 1 }
 0x509   :  { %799 = vsyncpa [#allocation6], 1 }
 0x50a   :  { %800 = vsyncpa [#allocation9], 1 }
 0x50b   :  { %801 = vsyncpa [#allocation4], 1 }

</bundles_post_ra>
